<compile_context>
chip_gen: v6e
topology: v6e:2x2x1
jax: 0.10.0
libtpu: 0.0.40
codegen_flags: <defaults>
</compile_context>

<pallas_src>
import functools

import jax
import jax.numpy as jnp
from jax.experimental import pallas as pl
from jax.experimental.pallas import tpu as pltpu

EPS_BN = 1e-5
_STATS_BLK = (8, 128)       # minimal f32 vreg-aligned block for per-tile stats


# ----------------------------------------------------------------------------
# helpers
# ----------------------------------------------------------------------------
def _pick_hw_tile(hw, max_t=2048):
    """Largest multiple of 128 that divides hw (<= max_t); else the full hw."""
    best = 0
    t = 128
    while t <= min(hw, max_t):
        if hw % t == 0:
            best = t
        t += 128
    return best if best > 0 else hw


def symmetric_fake_quant(w, k):
    """Per-tensor symmetric weight fake-quant (SymmetricQuantFunction)."""
    n = 2.0 ** (k - 1) - 1.0
    w_min, w_max = jnp.min(w), jnp.max(w)
    scale = jnp.maximum(jnp.maximum(jnp.abs(w_min), jnp.abs(w_max)), 1e-8) / n
    q = jnp.clip(jnp.round(w / scale), -n - 1.0, n)
    return q * scale


def fold_bn(w, gamma, beta, mean, var):
    sf = gamma / jnp.sqrt(var + EPS_BN)
    return w * sf[:, None, None, None], (0.0 - mean) * sf + beta


def _act_qparams(mn, mx, n_levels):
    """Asymmetric QuantAct scalars: [scale, 1/scale, zero_point] (f32, (3,))."""
    scale = jnp.maximum(mx - mn, 1e-8) / n_levels
    zp = jnp.round(mn / scale)
    return jnp.stack([scale, 1.0 / scale, zp]).astype(jnp.float32)


# ----------------------------------------------------------------------------
# stage 1: 1x1 conv (+folded BN bias) + ReLU + per-tile min/max
# ----------------------------------------------------------------------------
def pw1_kernel(x_ref, w_ref, b_ref, y_ref, mn_ref, mx_ref, *, compute_dtype):
    x = x_ref[0]                                          # (Cin, T)  lanes=T
    w = w_ref[...]                                        # (Cout, Cin)
    acc = jnp.dot(w.astype(compute_dtype), x.astype(compute_dtype),
                  preferred_element_type=jnp.float32)     # (Cout, T)
    acc = acc + b_ref[...]                                # (Cout, 1) broadcast
    acc = jnp.maximum(acc, 0.0)                           # fused ReLU
    y_ref[0] = acc.astype(y_ref.dtype)
    mn_ref[...] = jnp.full(mn_ref.shape, jnp.min(acc), mn_ref.dtype)
    mx_ref[...] = jnp.full(mx_ref.shape, jnp.max(acc), mx_ref.dtype)


def pw_conv_relu_stats(x3, w, b, *, compute_dtype=jnp.float32):
    """x3: (N, Cin, HW); w: (Cout, Cin); b: (Cout,) -> (y, min, max)."""
    N, Cin, HW = x3.shape
    Cout = w.shape[0]
    T = _pick_hw_tile(HW)
    n_t = HW // T
    y, mn_t, mx_t = pl.pallas_call(
        functools.partial(pw1_kernel, compute_dtype=compute_dtype),
        out_shape=(
            jax.ShapeDtypeStruct((N, Cout, HW), x3.dtype),
            jax.ShapeDtypeStruct((N, n_t) + _STATS_BLK, jnp.float32),
            jax.ShapeDtypeStruct((N, n_t) + _STATS_BLK, jnp.float32),
        ),
        grid=(N, n_t),
        in_specs=[
            pl.BlockSpec((1, Cin, T), lambda n, t: (n, 0, t)),
            pl.BlockSpec((Cout, Cin), lambda n, t: (0, 0)),
            pl.BlockSpec((Cout, 1), lambda n, t: (0, 0)),
        ],
        out_specs=(
            pl.BlockSpec((1, Cout, T), lambda n, t: (n, 0, t)),
            pl.BlockSpec((1, 1) + _STATS_BLK, lambda n, t: (n, t, 0, 0)),
            pl.BlockSpec((1, 1) + _STATS_BLK, lambda n, t: (n, t, 0, 0)),
        ),
        compiler_params=pltpu.CompilerParams(
            dimension_semantics=("parallel", "parallel")),
    )(x3, w, b.reshape(Cout, 1))
    return y, jnp.min(mn_t), jnp.max(mx_t)


# ----------------------------------------------------------------------------
# stage 2: fused QuantAct dequant + depthwise 3x3 + ReLU + per-tile min/max
# ----------------------------------------------------------------------------
def dw_kernel(q_ref, x_ref, w_ref, b_ref, m_ref, y_ref, mn_ref, mx_ref,
              *, W, n_levels):
    scale, inv_scale, zp = q_ref[0], q_ref[1], q_ref[2]
    x = x_ref[0]                                          # (C, HW) lanes=HW
    HW = x.shape[-1]

    # fused asymmetric fake-quant of the producer's ReLU output (QuantAct)
    q = jnp.clip(jnp.round(x * inv_scale) - zp, 0.0, n_levels)
    xq = (q + zp) * scale

    acc = jnp.zeros(x.shape, jnp.float32)
    for kh in range(3):
        for kw in range(3):
            k = 3 * kh + kw
            d = (kh - 1) * W + (kw - 1)                   # flat tap offset
            # shifted[p] = xq[(p + d) mod HW]; wrapped entries are killed by
            # the precomputed boundary mask m_ref[k].
            shifted = pltpu.roll(xq, shift=(-d) % HW, axis=1) if d != 0 else xq
            acc = acc + (shifted * m_ref[k]) * w_ref[k]   # (1,HW)*(C,1) bcasts
    acc = acc + b_ref[...]                                # (C, 1) broadcast
    acc = jnp.maximum(acc, 0.0)                           # fused ReLU
    y_ref[0] = acc.astype(y_ref.dtype)
    mn_ref[...] = jnp.full(mn_ref.shape, jnp.min(acc), mn_ref.dtype)
    mx_ref[...] = jnp.full(mx_ref.shape, jnp.max(acc), mx_ref.dtype)


def depthwise3x3_dequant_relu_stats(y1, qparams, w4d, b, H, W, *, n_levels):
    """y1: (N, C, HW); w4d: (C,1,3,3); b: (C,) -> (y2, min, max)."""
    N, C, HW = y1.shape
    w_taps = jnp.transpose(w4d.reshape(C, 9), (1, 0)).reshape(9, C, 1)

    # per-tap boundary masks over the flattened (H, W) spatial axis (built once
    # in the wrapper -> no in-kernel integer div/mod, arbitrary H, W).
    hh = jnp.arange(HW, dtype=jnp.int32) // W
    ww = jnp.arange(HW, dtype=jnp.int32) % W
    ones = jnp.ones((HW,), dtype=bool)
    h_masks = [hh >= 1, ones, hh <= H - 2]
    w_masks = [ww >= 1, ones, ww <= W - 2]
    mask9 = jnp.stack([(h_masks[kh] & w_masks[kw]).astype(jnp.float32)
                       for kh in range(3) for kw in range(3)]).reshape(9, 1, HW)

    y2, mn_t, mx_t = pl.pallas_call(
        functools.partial(dw_kernel, W=W, n_levels=n_levels),
        out_shape=(
            jax.ShapeDtypeStruct((N, C, HW), y1.dtype),
            jax.ShapeDtypeStruct((N,) + _STATS_BLK, jnp.float32),
            jax.ShapeDtypeStruct((N,) + _STATS_BLK, jnp.float32),
        ),
        grid=(N,),
        in_specs=[
            pl.BlockSpec(memory_space=pltpu.MemorySpace.SMEM),     # qparams (3,)
            pl.BlockSpec((1, C, HW), lambda n: (n, 0, 0)),
            pl.BlockSpec((9, C, 1), lambda n: (0, 0, 0)),
            pl.BlockSpec((C, 1), lambda n: (0, 0)),
            pl.BlockSpec((9, 1, HW), lambda n: (0, 0, 0)),
        ],
        out_specs=(
            pl.BlockSpec((1, C, HW), lambda n: (n, 0, 0)),
            pl.BlockSpec((1,) + _STATS_BLK, lambda n: (n, 0, 0)),
            pl.BlockSpec((1,) + _STATS_BLK, lambda n: (n, 0, 0)),
        ),
        compiler_params=pltpu.CompilerParams(dimension_semantics=("parallel",)),
    )(qparams, y1, w_taps, b.reshape(C, 1), mask9)
    return y2, jnp.min(mn_t), jnp.max(mx_t)


# ----------------------------------------------------------------------------
# stage 3: fused QuantAct dequant + 1x1 conv + bias
# ----------------------------------------------------------------------------
def pw3_kernel(q_ref, x_ref, w_ref, b_ref, o_ref, *, n_levels, compute_dtype):
    scale, inv_scale, zp = q_ref[0], q_ref[1], q_ref[2]
    x = x_ref[0]                                          # (Cmid, T)
    q = jnp.clip(jnp.round(x * inv_scale) - zp, 0.0, n_levels)
    xq = (q + zp) * scale
    acc = jnp.dot(w_ref[...].astype(compute_dtype), xq.astype(compute_dtype),
                  preferred_element_type=jnp.float32)     # (Cout, T)
    o_ref[0] = (acc + b_ref[...]).astype(o_ref.dtype)


def dequant_pw_conv(y2, qparams, w, b, *, n_levels, compute_dtype=jnp.float32):
    """y2: (N, Cmid, HW); w: (Cout, Cmid); b: (Cout,) -> (N, Cout, HW)."""
    N, Cmid, HW = y2.shape
    Cout = w.shape[0]
    T = _pick_hw_tile(HW)
    n_t = HW // T
    return pl.pallas_call(
        functools.partial(pw3_kernel, n_levels=n_levels,
                          compute_dtype=compute_dtype),
        out_shape=jax.ShapeDtypeStruct((N, Cout, HW), y2.dtype),
        grid=(N, n_t),
        in_specs=[
            pl.BlockSpec(memory_space=pltpu.MemorySpace.SMEM),     # qparams (3,)
            pl.BlockSpec((1, Cmid, T), lambda n, t: (n, 0, t)),
            pl.BlockSpec((Cout, Cmid), lambda n, t: (0, 0)),
            pl.BlockSpec((Cout, 1), lambda n, t: (0, 0)),
        ],
        out_specs=pl.BlockSpec((1, Cout, T), lambda n, t: (n, 0, t)),
        compiler_params=pltpu.CompilerParams(
            dimension_semantics=("parallel", "parallel")),
    )(qparams, y2, w, b.reshape(Cout, 1))


# ----------------------------------------------------------------------------
# QuantDepthwiseNode forward (3 fused pallas_calls, zero transposes / pads)
# ----------------------------------------------------------------------------
def quant_depthwise_node_forward(x, p, *, weight_bit=8, act_bit=8,
                                 compute_dtype=jnp.float32):
    N, Cin, H, W = x.shape
    n_levels = float(2 ** act_bit - 1)

    # tiny weight prep in plain JAX: BN fold + symmetric per-tensor fake-quant
    w1, b1 = fold_bn(p["conv1_w"], p["bn1_gamma"], p["bn1_beta"],
                     p["bn1_mean"], p["bn1_var"])
    w1q = symmetric_fake_quant(w1, weight_bit).reshape(w1.shape[0], Cin)
    w2, b2 = fold_bn(p["conv2_w"], p["bn2_gamma"], p["bn2_beta"],
                     p["bn2_mean"], p["bn2_var"])
    w2q = symmetric_fake_quant(w2, weight_bit)                        # (C,1,3,3)
    w3q = symmetric_fake_quant(p["conv3_w"], weight_bit)
    w3q = w3q.reshape(w3q.shape[0], w3q.shape[1])                     # (Cout,Cmid)

    x3 = x.reshape(N, Cin, H * W)                                     # free

    # stage 1: conv1 1x1 + BN + ReLU (+ batch min/max for QuantAct1)
    y1, mn1, mx1 = pw_conv_relu_stats(x3, w1q, b1, compute_dtype=compute_dtype)
    qp1 = _act_qparams(mn1, mx1, n_levels)

    # stage 2: QuantAct1 (fused) -> depthwise 3x3 + BN + ReLU (+ min/max)
    y2, mn2, mx2 = depthwise3x3_dequant_relu_stats(
        y1, qp1, w2q, b2, H, W, n_levels=n_levels)
    qp2 = _act_qparams(mn2, mx2, n_levels)

    # stage 3: QuantAct3 (fused) -> conv3 1x1 + fp bias
    out = dequant_pw_conv(y2, qp2, w3q, p["conv3_b"],
                          n_levels=n_levels, compute_dtype=compute_dtype)
    return out.reshape(N, -1, H, W)                                   # free


# ----------------------------------------------------------------------------
# Pure-JAX reference (lax convs) for a numerical sanity check
# ----------------------------------------------------------------------------
def _ref_act_quant(x, act_bit):
    n = 2.0 ** act_bit - 1.0
    xm, xM = jnp.min(x), jnp.max(x)
    scale = jnp.maximum(xM - xm, 1e-8) / n
    zp = jnp.round(xm / scale)
    q = jnp.clip(jnp.round(x * (1.0 / scale)) - zp, 0.0, n)
    return (q + zp) * scale


def reference_forward(x, p, *, weight_bit=8, act_bit=8):
    def conv(x, w, b, pad, groups):
        y = jax.lax.conv_general_dilated(
            x, w, window_strides=(1, 1), padding=[(pad, pad), (pad, pad)],
            feature_group_count=groups,
            dimension_numbers=("NCHW", "OIHW", "NCHW"))
        return y + b[None, :, None, None]

    w1, b1 = fold_bn(p["conv1_w"], p["bn1_gamma"], p["bn1_beta"],
                     p["bn1_mean"], p["bn1_var"])
    y = conv(x, symmetric_fake_quant(w1, weight_bit), b1, 0, 1)
    y = _ref_act_quant(jnp.maximum(y, 0.0), act_bit)

    w2, b2 = fold_bn(p["conv2_w"], p["bn2_gamma"], p["bn2_beta"],
                     p["bn2_mean"], p["bn2_var"])
    y = conv(y, symmetric_fake_quant(w2, weight_bit), b2, 1, w2.shape[0])
    y = _ref_act_quant(jnp.maximum(y, 0.0), act_bit)

    y = conv(y, symmetric_fake_quant(p["conv3_w"], weight_bit), p["conv3_b"], 0, 1)
    return y


# ----------------------------------------------------------------------------
if __name__ == "__main__":
    N, Cin, Cmid, Cout, H, W = 2, 4, 8, 16, 16, 16

    key = jax.random.PRNGKey(0)
    ks = jax.random.split(key, 13)
    params = dict(
        conv1_w=0.3 * jax.random.normal(ks[0], (Cmid, Cin, 1, 1), jnp.float32),
        bn1_gamma=1.0 + 0.1 * jax.random.normal(ks[1], (Cmid,), jnp.float32),
        bn1_beta=0.1 * jax.random.normal(ks[2], (Cmid,), jnp.float32),
        bn1_mean=0.1 * jax.random.normal(ks[3], (Cmid,), jnp.float32),
        bn1_var=0.5 + jnp.abs(jax.random.normal(ks[4], (Cmid,), jnp.float32)),
        conv2_w=0.3 * jax.random.normal(ks[5], (Cmid, 1, 3, 3), jnp.float32),
        bn2_gamma=1.0 + 0.1 * jax.random.normal(ks[6], (Cmid,), jnp.float32),
        bn2_beta=0.1 * jax.random.normal(ks[7], (Cmid,), jnp.float32),
        bn2_mean=0.1 * jax.random.normal(ks[8], (Cmid,), jnp.float32),
        bn2_var=0.5 + jnp.abs(jax.random.normal(ks[9], (Cmid,), jnp.float32)),
        conv3_w=0.3 * jax.random.normal(ks[10], (Cout, Cmid, 1, 1), jnp.float32),
        conv3_b=0.1 * jax.random.normal(ks[11], (Cout,), jnp.float32),
    )
    x = jax.random.normal(ks[12], (N, Cin, H, W), jnp.float32)

    fwd = jax.jit(functools.partial(quant_depthwise_node_forward,
                                    weight_bit=8, act_bit=8))
    out = jax.block_until_ready(fwd(x, params))
    assert out.shape == (N, Cout, H, W), out.shape

    ref = reference_forward(x, params, weight_bit=8, act_bit=8)
    max_err = float(jnp.max(jnp.abs(out - ref)))
    assert jnp.allclose(out, ref, atol=2e-2, rtol=1e-3), max_err

    print("KERNEL_OK")
</pallas_src>

<mosaic_0001>
module attributes {stable_mosaic.version = 11 : i64} {
  func.func @pw1_kernel(%arg0: i32, %arg1: i32, %arg2: memref<1x4x256xf32, #tpu.memory_space<vmem>>, %arg3: memref<8x4xf32, #tpu.memory_space<vmem>>, %arg4: memref<8x1xf32, #tpu.memory_space<vmem>>, %arg5: memref<1x8x256xf32, #tpu.memory_space<vmem>>, %arg6: memref<1x1x8x128xf32, #tpu.memory_space<vmem>>, %arg7: memref<1x1x8x128xf32, #tpu.memory_space<vmem>>) attributes {dimension_semantics = [#tpu.dimension_semantics<parallel>, #tpu.dimension_semantics<parallel>], iteration_bounds = array<i64: 2, 1>, scalar_prefetch = 0 : i64, scratch_operands = 0 : i64, tpu.core_type = #tpu.core_type<tc>, window_params = [{transform_indices = @transform_0, window_bounds = array<i64: 1, 4, 256>}, {pipeline_mode = #tpu.pipeline_mode<synchronous>, transform_indices = @transform_1, window_bounds = array<i64: 8, 4>}, {pipeline_mode = #tpu.pipeline_mode<synchronous>, transform_indices = @transform_2, window_bounds = array<i64: 8, 1>}, {transform_indices = @transform_3, window_bounds = array<i64: 1, 8, 256>}, {transform_indices = @transform_4, window_bounds = array<i64: 1, 1, 8, 128>}, {transform_indices = @transform_5, window_bounds = array<i64: 1, 1, 8, 128>}]} {
    %c0 = arith.constant 0 : index
    %c0_0 = arith.constant 0 : index
    %c0_1 = arith.constant 0 : index
    %0 = vector.load %arg2[%c0, %c0_0, %c0_1] : memref<1x4x256xf32, #tpu.memory_space<vmem>>, vector<1x4x256xf32>
    %1 = vector.shape_cast %0 : vector<1x4x256xf32> to vector<4x256xf32>
    %c0_2 = arith.constant 0 : index
    %c0_3 = arith.constant 0 : index
    %2 = vector.load %arg3[%c0_2, %c0_3] : memref<8x4xf32, #tpu.memory_space<vmem>>, vector<8x4xf32>
    %cst = arith.constant dense<0.000000e+00> : vector<8x256xf32>
    %3 = tpu.matmul %2, %1, %cst {dimension_numbers = #tpu.dot_dimension_numbers<[1], [0], [0], [1], [0, 0, 1, 1], [], []>} : vector<8x4xf32>, vector<4x256xf32>, vector<8x256xf32> -> vector<8x256xf32>
    %c0_4 = arith.constant 0 : index
    %c0_5 = arith.constant 0 : index
    %4 = vector.load %arg4[%c0_4, %c0_5] : memref<8x1xf32, #tpu.memory_space<vmem>>, vector<8x1xf32>
    %5 = vector.broadcast %4 : vector<8x1xf32> to vector<8x256xf32>
    %6 = arith.addf %3, %5 : vector<8x256xf32>
    %cst_6 = arith.constant 0.000000e+00 : f32
    %7 = vector.broadcast %cst_6 : f32 to vector<8x256xf32>
    %8 = arith.maximumf %6, %7 : vector<8x256xf32>
    %c0_7 = arith.constant 0 : index
    %c0_8 = arith.constant 0 : index
    %c0_9 = arith.constant 0 : index
    %9 = vector.load %arg5[%c0_7, %c0_8, %c0_9] : memref<1x8x256xf32, #tpu.memory_space<vmem>>, vector<1x8x256xf32>
    %10 = vector.shape_cast %9 : vector<1x8x256xf32> to vector<8x256xf32>
    %11 = vector.shape_cast %8 : vector<8x256xf32> to vector<1x8x256xf32>
    tpu.vector_store %arg5[%c0_7, %c0_8, %c0_9], %11 {strides = array<i32>} : memref<1x8x256xf32, #tpu.memory_space<vmem>>, vector<1x8x256xf32>,
    %12 = vector.shape_cast %8 : vector<8x256xf32> to vector<1x8x256xf32>
    %cst_10 = arith.constant dense<0x7F800000> : vector<1xf32>
    %13 = vector.multi_reduction <minimumf>, %12, %cst_10 [1, 2] : vector<1x8x256xf32> to vector<1xf32>
    %14 = vector.shape_cast %13 : vector<1xf32> to vector<1x1x1xf32>
    %15 = vector.extract %14[0, 0, 0] : f32 from vector<1x1x1xf32>
    %16 = vector.broadcast %15 : f32 to vector<1x1x8x128xf32>
    %c0_11 = arith.constant 0 : index
    %c0_12 = arith.constant 0 : index
    %c0_13 = arith.constant 0 : index
    %c0_14 = arith.constant 0 : index
    %17 = vector.load %arg6[%c0_11, %c0_12, %c0_13, %c0_14] : memref<1x1x8x128xf32, #tpu.memory_space<vmem>>, vector<1x1x8x128xf32>
    tpu.vector_store %arg6[%c0_11, %c0_12, %c0_13, %c0_14], %16 {strides = array<i32>} : memref<1x1x8x128xf32, #tpu.memory_space<vmem>>, vector<1x1x8x128xf32>,
    %18 = vector.shape_cast %8 : vector<8x256xf32> to vector<1x8x256xf32>
    %cst_15 = arith.constant dense<0xFF800000> : vector<1xf32>
    %19 = vector.multi_reduction <maximumf>, %18, %cst_15 [1, 2] : vector<1x8x256xf32> to vector<1xf32>
    %20 = vector.shape_cast %19 : vector<1xf32> to vector<1x1x1xf32>
    %21 = vector.extract %20[0, 0, 0] : f32 from vector<1x1x1xf32>
    %22 = vector.broadcast %21 : f32 to vector<1x1x8x128xf32>
    %c0_16 = arith.constant 0 : index
    %c0_17 = arith.constant 0 : index
    %c0_18 = arith.constant 0 : index
    %c0_19 = arith.constant 0 : index
    %23 = vector.load %arg7[%c0_16, %c0_17, %c0_18, %c0_19] : memref<1x1x8x128xf32, #tpu.memory_space<vmem>>, vector<1x1x8x128xf32>
    tpu.vector_store %arg7[%c0_16, %c0_17, %c0_18, %c0_19], %22 {strides = array<i32>} : memref<1x1x8x128xf32, #tpu.memory_space<vmem>>, vector<1x1x8x128xf32>,
    return
  }
  func.func @transform_0(%arg0: i32, %arg1: i32) -> (i32, i32, i32) {
    %c0_i32 = arith.constant 0 : i32
    %c0_i32_0 = arith.constant 0 : i32
    return %arg0, %c0_i32, %arg1 : i32, i32, i32
  }
  func.func @transform_1(%arg0: i32, %arg1: i32) -> (i32, i32) {
    %c0_i32 = arith.constant 0 : i32
    %c0_i32_0 = arith.constant 0 : i32
    %c0_i32_1 = arith.constant 0 : i32
    return %c0_i32, %c0_i32_0 : i32, i32
  }
  func.func @transform_2(%arg0: i32, %arg1: i32) -> (i32, i32) {
    %c0_i32 = arith.constant 0 : i32
    %c0_i32_0 = arith.constant 0 : i32
    %c0_i32_1 = arith.constant 0 : i32
    return %c0_i32, %c0_i32_0 : i32, i32
  }
  func.func @transform_3(%arg0: i32, %arg1: i32) -> (i32, i32, i32) {
    %c0_i32 = arith.constant 0 : i32
    %c0_i32_0 = arith.constant 0 : i32
    return %arg0, %c0_i32, %arg1 : i32, i32, i32
  }
  func.func @transform_4(%arg0: i32, %arg1: i32) -> (i32, i32, i32, i32) {
    %c0_i32 = arith.constant 0 : i32
    %c0_i32_0 = arith.constant 0 : i32
    %c0_i32_1 = arith.constant 0 : i32
    return %arg0, %arg1, %c0_i32, %c0_i32_0 : i32, i32, i32, i32
  }
  func.func @transform_5(%arg0: i32, %arg1: i32) -> (i32, i32, i32, i32) {
    %c0_i32 = arith.constant 0 : i32
    %c0_i32_0 = arith.constant 0 : i32
    %c0_i32_1 = arith.constant 0 : i32
    return %arg0, %arg1, %c0_i32, %c0_i32_0 : i32, i32, i32, i32
  }
}

module attributes {stable_mosaic.version = 11 : i64} {
  func.func @pw3_kernel(%arg0: i32, %arg1: i32, %arg2: memref<3xf32, #tpu.memory_space<smem>>, %arg3: memref<1x8x256xf32, #tpu.memory_space<vmem>>, %arg4: memref<16x8xf32, #tpu.memory_space<vmem>>, %arg5: memref<16x1xf32, #tpu.memory_space<vmem>>, %arg6: memref<1x16x256xf32, #tpu.memory_space<vmem>>) attributes {dimension_semantics = [#tpu.dimension_semantics<parallel>, #tpu.dimension_semantics<parallel>], iteration_bounds = array<i64: 2, 1>, scalar_prefetch = 0 : i64, scratch_operands = 0 : i64, tpu.core_type = #tpu.core_type<tc>, window_params = [{transform_indices = @transform_0, window_bounds = array<i64: 3>}, {transform_indices = @transform_1, window_bounds = array<i64: 1, 8, 256>}, {pipeline_mode = #tpu.pipeline_mode<synchronous>, transform_indices = @transform_2, window_bounds = array<i64: 16, 8>}, {pipeline_mode = #tpu.pipeline_mode<synchronous>, transform_indices = @transform_3, window_bounds = array<i64: 16, 1>}, {transform_indices = @transform_4, window_bounds = array<i64: 1, 16, 256>}]} {
    %c0 = arith.constant 0 : index
    %0 = memref.load %arg2[%c0] : memref<3xf32, #tpu.memory_space<smem>>
    %c1 = arith.constant 1 : index
    %1 = memref.load %arg2[%c1] : memref<3xf32, #tpu.memory_space<smem>>
    %c2 = arith.constant 2 : index
    %2 = memref.load %arg2[%c2] : memref<3xf32, #tpu.memory_space<smem>>
    %c0_0 = arith.constant 0 : index
    %c0_1 = arith.constant 0 : index
    %c0_2 = arith.constant 0 : index
    %3 = vector.load %arg3[%c0_0, %c0_1, %c0_2] : memref<1x8x256xf32, #tpu.memory_space<vmem>>, vector<1x8x256xf32>
    %4 = vector.shape_cast %3 : vector<1x8x256xf32> to vector<8x256xf32>
    %5 = vector.broadcast %1 : f32 to vector<8x256xf32>
    %6 = arith.mulf %4, %5 : vector<8x256xf32>
    %7 = math.roundeven %6 : vector<8x256xf32>
    %8 = vector.broadcast %2 : f32 to vector<8x256xf32>
    %9 = arith.subf %7, %8 : vector<8x256xf32>
    %cst = arith.constant 0.000000e+00 : f32
    %cst_3 = arith.constant 2.550000e+02 : f32
    %10 = vector.broadcast %cst : f32 to vector<8x256xf32>
    %11 = arith.maximumf %10, %9 : vector<8x256xf32>
    %12 = vector.broadcast %cst_3 : f32 to vector<8x256xf32>
    %13 = arith.minimumf %12, %11 : vector<8x256xf32>
    %14 = vector.broadcast %2 : f32 to vector<8x256xf32>
    %15 = arith.addf %13, %14 : vector<8x256xf32>
    %16 = vector.broadcast %0 : f32 to vector<8x256xf32>
    %17 = arith.mulf %15, %16 : vector<8x256xf32>
    %c0_4 = arith.constant 0 : index
    %c0_5 = arith.constant 0 : index
    %18 = vector.load %arg4[%c0_4, %c0_5] : memref<16x8xf32, #tpu.memory_space<vmem>>, vector<16x8xf32>
    %cst_6 = arith.constant dense<0.000000e+00> : vector<16x256xf32>
    %19 = tpu.matmul %18, %17, %cst_6 {dimension_numbers = #tpu.dot_dimension_numbers<[1], [0], [0], [1], [0, 0, 1, 1], [], []>} : vector<16x8xf32>, vector<8x256xf32>, vector<16x256xf32> -> vector<16x256xf32>
    %c0_7 = arith.constant 0 : index
    %c0_8 = arith.constant 0 : index
    %20 = vector.load %arg5[%c0_7, %c0_8] : memref<16x1xf32, #tpu.memory_space<vmem>>, vector<16x1xf32>
    %21 = vector.broadcast %20 : vector<16x1xf32> to vector<16x256xf32>
    %22 = arith.addf %19, %21 : vector<16x256xf32>
    %c0_9 = arith.constant 0 : index
    %c0_10 = arith.constant 0 : index
    %c0_11 = arith.constant 0 : index
    %23 = vector.load %arg6[%c0_9, %c0_10, %c0_11] : memref<1x16x256xf32, #tpu.memory_space<vmem>>, vector<1x16x256xf32>
    %24 = vector.shape_cast %23 : vector<1x16x256xf32> to vector<16x256xf32>
    %25 = vector.shape_cast %22 : vector<16x256xf32> to vector<1x16x256xf32>
    tpu.vector_store %arg6[%c0_9, %c0_10, %c0_11], %25 {strides = array<i32>} : memref<1x16x256xf32, #tpu.memory_space<vmem>>, vector<1x16x256xf32>,
    return
  }
  func.func @transform_0(%arg0: i32, %arg1: i32) -> i32 {
    %c0_i32 = arith.constant 0 : i32
    %c0_i32_0 = arith.constant 0 : i32
    return %c0_i32 : i32
  }
  func.func @transform_1(%arg0: i32, %arg1: i32) -> (i32, i32, i32) {
    %c0_i32 = arith.constant 0 : i32
    %c0_i32_0 = arith.constant 0 : i32
    return %arg0, %c0_i32, %arg1 : i32, i32, i32
  }
  func.func @transform_2(%arg0: i32, %arg1: i32) -> (i32, i32) {
    %c0_i32 = arith.constant 0 : i32
    %c0_i32_0 = arith.constant 0 : i32
    %c0_i32_1 = arith.constant 0 : i32
    return %c0_i32, %c0_i32_0 : i32, i32
  }
  func.func @transform_3(%arg0: i32, %arg1: i32) -> (i32, i32) {
    %c0_i32 = arith.constant 0 : i32
    %c0_i32_0 = arith.constant 0 : i32
    %c0_i32_1 = arith.constant 0 : i32
    return %c0_i32, %c0_i32_0 : i32, i32
  }
  func.func @transform_4(%arg0: i32, %arg1: i32) -> (i32, i32, i32) {
    %c0_i32 = arith.constant 0 : i32
    %c0_i32_0 = arith.constant 0 : i32
    return %arg0, %c0_i32, %arg1 : i32, i32, i32
  }
}

module attributes {stable_mosaic.version = 11 : i64} {
  func.func @dw_kernel(%arg0: i32, %arg1: memref<3xf32, #tpu.memory_space<smem>>, %arg2: memref<1x8x256xf32, #tpu.memory_space<vmem>>, %arg3: memref<9x8x1xf32, #tpu.memory_space<vmem>>, %arg4: memref<8x1xf32, #tpu.memory_space<vmem>>, %arg5: memref<9x1x256xf32, #tpu.memory_space<vmem>>, %arg6: memref<1x8x256xf32, #tpu.memory_space<vmem>>, %arg7: memref<1x8x128xf32, #tpu.memory_space<vmem>>, %arg8: memref<1x8x128xf32, #tpu.memory_space<vmem>>) attributes {dimension_semantics = [#tpu.dimension_semantics<parallel>], iteration_bounds = array<i64: 2>, scalar_prefetch = 0 : i64, scratch_operands = 0 : i64, tpu.core_type = #tpu.core_type<tc>, window_params = [{transform_indices = @transform_0, window_bounds = array<i64: 3>}, {transform_indices = @transform_1, window_bounds = array<i64: 1, 8, 256>}, {pipeline_mode = #tpu.pipeline_mode<synchronous>, transform_indices = @transform_2, window_bounds = array<i64: 9, 8, 1>}, {pipeline_mode = #tpu.pipeline_mode<synchronous>, transform_indices = @transform_3, window_bounds = array<i64: 8, 1>}, {pipeline_mode = #tpu.pipeline_mode<synchronous>, transform_indices = @transform_4, window_bounds = array<i64: 9, 1, 256>}, {transform_indices = @transform_5, window_bounds = array<i64: 1, 8, 256>}, {transform_indices = @transform_6, window_bounds = array<i64: 1, 8, 128>}, {transform_indices = @transform_7, window_bounds = array<i64: 1, 8, 128>}]} {
    %c0 = arith.constant 0 : index
    %0 = memref.load %arg1[%c0] : memref<3xf32, #tpu.memory_space<smem>>
    %c1 = arith.constant 1 : index
    %1 = memref.load %arg1[%c1] : memref<3xf32, #tpu.memory_space<smem>>
    %c2 = arith.constant 2 : index
    %2 = memref.load %arg1[%c2] : memref<3xf32, #tpu.memory_space<smem>>
    %c0_0 = arith.constant 0 : index
    %c0_1 = arith.constant 0 : index
    %c0_2 = arith.constant 0 : index
    %3 = vector.load %arg2[%c0_0, %c0_1, %c0_2] : memref<1x8x256xf32, #tpu.memory_space<vmem>>, vector<1x8x256xf32>
    %4 = vector.shape_cast %3 : vector<1x8x256xf32> to vector<8x256xf32>
    %5 = vector.broadcast %1 : f32 to vector<8x256xf32>
    %6 = arith.mulf %4, %5 : vector<8x256xf32>
    %7 = math.roundeven %6 : vector<8x256xf32>
    %8 = vector.broadcast %2 : f32 to vector<8x256xf32>
    %9 = arith.subf %7, %8 : vector<8x256xf32>
    %cst = arith.constant 0.000000e+00 : f32
    %cst_3 = arith.constant 2.550000e+02 : f32
    %10 = vector.broadcast %cst : f32 to vector<8x256xf32>
    %11 = arith.maximumf %10, %9 : vector<8x256xf32>
    %12 = vector.broadcast %cst_3 : f32 to vector<8x256xf32>
    %13 = arith.minimumf %12, %11 : vector<8x256xf32>
    %14 = vector.broadcast %2 : f32 to vector<8x256xf32>
    %15 = arith.addf %13, %14 : vector<8x256xf32>
    %16 = vector.broadcast %0 : f32 to vector<8x256xf32>
    %17 = arith.mulf %15, %16 : vector<8x256xf32>
    %cst_4 = arith.constant 0.000000e+00 : f32
    %18 = vector.broadcast %cst_4 : f32 to vector<8x256xf32>
    %c17_i32 = arith.constant 17 : i32
    %19 = tpu.dynamic_rotate %17 by %c17_i32 dim 1 : vector<8x256xf32>, i32 -> vector<8x256xf32>
    %c0_5 = arith.constant 0 : index
    %c0_6 = arith.constant 0 : index
    %c0_7 = arith.constant 0 : index
    %20 = vector.load %arg5[%c0_5, %c0_6, %c0_7] : memref<9x1x256xf32, #tpu.memory_space<vmem>>, vector<1x1x256xf32>
    %21 = vector.shape_cast %20 : vector<1x1x256xf32> to vector<1x256xf32>
    %22 = vector.broadcast %21 : vector<1x256xf32> to vector<8x256xf32>
    %23 = arith.mulf %19, %22 : vector<8x256xf32>
    %c0_8 = arith.constant 0 : index
    %c0_9 = arith.constant 0 : index
    %c0_10 = arith.constant 0 : index
    %24 = vector.load %arg3[%c0_8, %c0_9, %c0_10] : memref<9x8x1xf32, #tpu.memory_space<vmem>>, vector<1x8x1xf32>
    %25 = vector.shape_cast %24 : vector<1x8x1xf32> to vector<8x1xf32>
    %26 = vector.broadcast %25 : vector<8x1xf32> to vector<8x256xf32>
    %27 = arith.mulf %23, %26 : vector<8x256xf32>
    %28 = arith.addf %18, %27 : vector<8x256xf32>
    %c16_i32 = arith.constant 16 : i32
    %29 = tpu.dynamic_rotate %17 by %c16_i32 dim 1 : vector<8x256xf32>, i32 -> vector<8x256xf32>
    %c1_11 = arith.constant 1 : index
    %c0_12 = arith.constant 0 : index
    %c0_13 = arith.constant 0 : index
    %30 = vector.load %arg5[%c1_11, %c0_12, %c0_13] : memref<9x1x256xf32, #tpu.memory_space<vmem>>, vector<1x1x256xf32>
    %31 = vector.shape_cast %30 : vector<1x1x256xf32> to vector<1x256xf32>
    %32 = vector.broadcast %31 : vector<1x256xf32> to vector<8x256xf32>
    %33 = arith.mulf %29, %32 : vector<8x256xf32>
    %c1_14 = arith.constant 1 : index
    %c0_15 = arith.constant 0 : index
    %c0_16 = arith.constant 0 : index
    %34 = vector.load %arg3[%c1_14, %c0_15, %c0_16] : memref<9x8x1xf32, #tpu.memory_space<vmem>>, vector<1x8x1xf32>
    %35 = vector.shape_cast %34 : vector<1x8x1xf32> to vector<8x1xf32>
    %36 = vector.broadcast %35 : vector<8x1xf32> to vector<8x256xf32>
    %37 = arith.mulf %33, %36 : vector<8x256xf32>
    %38 = arith.addf %28, %37 : vector<8x256xf32>
    %c15_i32 = arith.constant 15 : i32
    %39 = tpu.dynamic_rotate %17 by %c15_i32 dim 1 : vector<8x256xf32>, i32 -> vector<8x256xf32>
    %c2_17 = arith.constant 2 : index
    %c0_18 = arith.constant 0 : index
    %c0_19 = arith.constant 0 : index
    %40 = vector.load %arg5[%c2_17, %c0_18, %c0_19] : memref<9x1x256xf32, #tpu.memory_space<vmem>>, vector<1x1x256xf32>
    %41 = vector.shape_cast %40 : vector<1x1x256xf32> to vector<1x256xf32>
    %42 = vector.broadcast %41 : vector<1x256xf32> to vector<8x256xf32>
    %43 = arith.mulf %39, %42 : vector<8x256xf32>
    %c2_20 = arith.constant 2 : index
    %c0_21 = arith.constant 0 : index
    %c0_22 = arith.constant 0 : index
    %44 = vector.load %arg3[%c2_20, %c0_21, %c0_22] : memref<9x8x1xf32, #tpu.memory_space<vmem>>, vector<1x8x1xf32>
    %45 = vector.shape_cast %44 : vector<1x8x1xf32> to vector<8x1xf32>
    %46 = vector.broadcast %45 : vector<8x1xf32> to vector<8x256xf32>
    %47 = arith.mulf %43, %46 : vector<8x256xf32>
    %48 = arith.addf %38, %47 : vector<8x256xf32>
    %c1_i32 = arith.constant 1 : i32
    %49 = tpu.dynamic_rotate %17 by %c1_i32 dim 1 : vector<8x256xf32>, i32 -> vector<8x256xf32>
    %c3 = arith.constant 3 : index
    %c0_23 = arith.constant 0 : index
    %c0_24 = arith.constant 0 : index
    %50 = vector.load %arg5[%c3, %c0_23, %c0_24] : memref<9x1x256xf32, #tpu.memory_space<vmem>>, vector<1x1x256xf32>
    %51 = vector.shape_cast %50 : vector<1x1x256xf32> to vector<1x256xf32>
    %52 = vector.broadcast %51 : vector<1x256xf32> to vector<8x256xf32>
    %53 = arith.mulf %49, %52 : vector<8x256xf32>
    %c3_25 = arith.constant 3 : index
    %c0_26 = arith.constant 0 : index
    %c0_27 = arith.constant 0 : index
    %54 = vector.load %arg3[%c3_25, %c0_26, %c0_27] : memref<9x8x1xf32, #tpu.memory_space<vmem>>, vector<1x8x1xf32>
    %55 = vector.shape_cast %54 : vector<1x8x1xf32> to vector<8x1xf32>
    %56 = vector.broadcast %55 : vector<8x1xf32> to vector<8x256xf32>
    %57 = arith.mulf %53, %56 : vector<8x256xf32>
    %58 = arith.addf %48, %57 : vector<8x256xf32>
    %c4 = arith.constant 4 : index
    %c0_28 = arith.constant 0 : index
    %c0_29 = arith.constant 0 : index
    %59 = vector.load %arg5[%c4, %c0_28, %c0_29] : memref<9x1x256xf32, #tpu.memory_space<vmem>>, vector<1x1x256xf32>
    %60 = vector.shape_cast %59 : vector<1x1x256xf32> to vector<1x256xf32>
    %61 = vector.broadcast %60 : vector<1x256xf32> to vector<8x256xf32>
    %62 = arith.mulf %17, %61 : vector<8x256xf32>
    %c4_30 = arith.constant 4 : index
    %c0_31 = arith.constant 0 : index
    %c0_32 = arith.constant 0 : index
    %63 = vector.load %arg3[%c4_30, %c0_31, %c0_32] : memref<9x8x1xf32, #tpu.memory_space<vmem>>, vector<1x8x1xf32>
    %64 = vector.shape_cast %63 : vector<1x8x1xf32> to vector<8x1xf32>
    %65 = vector.broadcast %64 : vector<8x1xf32> to vector<8x256xf32>
    %66 = arith.mulf %62, %65 : vector<8x256xf32>
    %67 = arith.addf %58, %66 : vector<8x256xf32>
    %c255_i32 = arith.constant 255 : i32
    %68 = tpu.dynamic_rotate %17 by %c255_i32 dim 1 : vector<8x256xf32>, i32 -> vector<8x256xf32>
    %c5 = arith.constant 5 : index
    %c0_33 = arith.constant 0 : index
    %c0_34 = arith.constant 0 : index
    %69 = vector.load %arg5[%c5, %c0_33, %c0_34] : memref<9x1x256xf32, #tpu.memory_space<vmem>>, vector<1x1x256xf32>
    %70 = vector.shape_cast %69 : vector<1x1x256xf32> to vector<1x256xf32>
    %71 = vector.broadcast %70 : vector<1x256xf32> to vector<8x256xf32>
    %72 = arith.mulf %68, %71 : vector<8x256xf32>
    %c5_35 = arith.constant 5 : index
    %c0_36 = arith.constant 0 : index
    %c0_37 = arith.constant 0 : index
    %73 = vector.load %arg3[%c5_35, %c0_36, %c0_37] : memref<9x8x1xf32, #tpu.memory_space<vmem>>, vector<1x8x1xf32>
    %74 = vector.shape_cast %73 : vector<1x8x1xf32> to vector<8x1xf32>
    %75 = vector.broadcast %74 : vector<8x1xf32> to vector<8x256xf32>
    %76 = arith.mulf %72, %75 : vector<8x256xf32>
    %77 = arith.addf %67, %76 : vector<8x256xf32>
    %c241_i32 = arith.constant 241 : i32
    %78 = tpu.dynamic_rotate %17 by %c241_i32 dim 1 : vector<8x256xf32>, i32 -> vector<8x256xf32>
    %c6 = arith.constant 6 : index
    %c0_38 = arith.constant 0 : index
    %c0_39 = arith.constant 0 : index
    %79 = vector.load %arg5[%c6, %c0_38, %c0_39] : memref<9x1x256xf32, #tpu.memory_space<vmem>>, vector<1x1x256xf32>
    %80 = vector.shape_cast %79 : vector<1x1x256xf32> to vector<1x256xf32>
    %81 = vector.broadcast %80 : vector<1x256xf32> to vector<8x256xf32>
    %82 = arith.mulf %78, %81 : vector<8x256xf32>
    %c6_40 = arith.constant 6 : index
    %c0_41 = arith.constant 0 : index
    %c0_42 = arith.constant 0 : index
    %83 = vector.load %arg3[%c6_40, %c0_41, %c0_42] : memref<9x8x1xf32, #tpu.memory_space<vmem>>, vector<1x8x1xf32>
    %84 = vector.shape_cast %83 : vector<1x8x1xf32> to vector<8x1xf32>
    %85 = vector.broadcast %84 : vector<8x1xf32> to vector<8x256xf32>
    %86 = arith.mulf %82, %85 : vector<8x256xf32>
    %87 = arith.addf %77, %86 : vector<8x256xf32>
    %c240_i32 = arith.constant 240 : i32
    %88 = tpu.dynamic_rotate %17 by %c240_i32 dim 1 : vector<8x256xf32>, i32 -> vector<8x256xf32>
    %c7 = arith.constant 7 : index
    %c0_43 = arith.constant 0 : index
    %c0_44 = arith.constant 0 : index
    %89 = vector.load %arg5[%c7, %c0_43, %c0_44] : memref<9x1x256xf32, #tpu.memory_space<vmem>>, vector<1x1x256xf32>
    %90 = vector.shape_cast %89 : vector<1x1x256xf32> to vector<1x256xf32>
    %91 = vector.broadcast %90 : vector<1x256xf32> to vector<8x256xf32>
    %92 = arith.mulf %88, %91 : vector<8x256xf32>
    %c7_45 = arith.constant 7 : index
    %c0_46 = arith.constant 0 : index
    %c0_47 = arith.constant 0 : index
    %93 = vector.load %arg3[%c7_45, %c0_46, %c0_47] : memref<9x8x1xf32, #tpu.memory_space<vmem>>, vector<1x8x1xf32>
    %94 = vector.shape_cast %93 : vector<1x8x1xf32> to vector<8x1xf32>
    %95 = vector.broadcast %94 : vector<8x1xf32> to vector<8x256xf32>
    %96 = arith.mulf %92, %95 : vector<8x256xf32>
    %97 = arith.addf %87, %96 : vector<8x256xf32>
    %c239_i32 = arith.constant 239 : i32
    %98 = tpu.dynamic_rotate %17 by %c239_i32 dim 1 : vector<8x256xf32>, i32 -> vector<8x256xf32>
    %c8 = arith.constant 8 : index
    %c0_48 = arith.constant 0 : index
    %c0_49 = arith.constant 0 : index
    %99 = vector.load %arg5[%c8, %c0_48, %c0_49] : memref<9x1x256xf32, #tpu.memory_space<vmem>>, vector<1x1x256xf32>
    %100 = vector.shape_cast %99 : vector<1x1x256xf32> to vector<1x256xf32>
    %101 = vector.broadcast %100 : vector<1x256xf32> to vector<8x256xf32>
    %102 = arith.mulf %98, %101 : vector<8x256xf32>
    %c8_50 = arith.constant 8 : index
    %c0_51 = arith.constant 0 : index
    %c0_52 = arith.constant 0 : index
    %103 = vector.load %arg3[%c8_50, %c0_51, %c0_52] : memref<9x8x1xf32, #tpu.memory_space<vmem>>, vector<1x8x1xf32>
    %104 = vector.shape_cast %103 : vector<1x8x1xf32> to vector<8x1xf32>
    %105 = vector.broadcast %104 : vector<8x1xf32> to vector<8x256xf32>
    %106 = arith.mulf %102, %105 : vector<8x256xf32>
    %107 = arith.addf %97, %106 : vector<8x256xf32>
    %c0_53 = arith.constant 0 : index
    %c0_54 = arith.constant 0 : index
    %108 = vector.load %arg4[%c0_53, %c0_54] : memref<8x1xf32, #tpu.memory_space<vmem>>, vector<8x1xf32>
    %109 = vector.broadcast %108 : vector<8x1xf32> to vector<8x256xf32>
    %110 = arith.addf %107, %109 : vector<8x256xf32>
    %cst_55 = arith.constant 0.000000e+00 : f32
    %111 = vector.broadcast %cst_55 : f32 to vector<8x256xf32>
    %112 = arith.maximumf %110, %111 : vector<8x256xf32>
    %c0_56 = arith.constant 0 : index
    %c0_57 = arith.constant 0 : index
    %c0_58 = arith.constant 0 : index
    %113 = vector.load %arg6[%c0_56, %c0_57, %c0_58] : memref<1x8x256xf32, #tpu.memory_space<vmem>>, vector<1x8x256xf32>
    %114 = vector.shape_cast %113 : vector<1x8x256xf32> to vector<8x256xf32>
    %115 = vector.shape_cast %112 : vector<8x256xf32> to vector<1x8x256xf32>
    tpu.vector_store %arg6[%c0_56, %c0_57, %c0_58], %115 {strides = array<i32>} : memref<1x8x256xf32, #tpu.memory_space<vmem>>, vector<1x8x256xf32>,
    %116 = vector.shape_cast %112 : vector<8x256xf32> to vector<1x8x256xf32>
    %cst_59 = arith.constant dense<0x7F800000> : vector<1xf32>
    %117 = vector.multi_reduction <minimumf>, %116, %cst_59 [1, 2] : vector<1x8x256xf32> to vector<1xf32>
    %118 = vector.shape_cast %117 : vector<1xf32> to vector<1x1x1xf32>
    %119 = vector.extract %118[0, 0, 0] : f32 from vector<1x1x1xf32>
    %120 = vector.broadcast %119 : f32 to vector<1x8x128xf32>
    %c0_60 = arith.constant 0 : index
    %c0_61 = arith.constant 0 : index
    %c0_62 = arith.constant 0 : index
    %121 = vector.load %arg7[%c0_60, %c0_61, %c0_62] : memref<1x8x128xf32, #tpu.memory_space<vmem>>, vector<1x8x128xf32>
    tpu.vector_store %arg7[%c0_60, %c0_61, %c0_62], %120 {strides = array<i32>} : memref<1x8x128xf32, #tpu.memory_space<vmem>>, vector<1x8x128xf32>,
    %122 = vector.shape_cast %112 : vector<8x256xf32> to vector<1x8x256xf32>
    %cst_63 = arith.constant dense<0xFF800000> : vector<1xf32>
    %123 = vector.multi_reduction <maximumf>, %122, %cst_63 [1, 2] : vector<1x8x256xf32> to vector<1xf32>
    %124 = vector.shape_cast %123 : vector<1xf32> to vector<1x1x1xf32>
    %125 = vector.extract %124[0, 0, 0] : f32 from vector<1x1x1xf32>
    %126 = vector.broadcast %125 : f32 to vector<1x8x128xf32>
    %c0_64 = arith.constant 0 : index
    %c0_65 = arith.constant 0 : index
    %c0_66 = arith.constant 0 : index
    %127 = vector.load %arg8[%c0_64, %c0_65, %c0_66] : memref<1x8x128xf32, #tpu.memory_space<vmem>>, vector<1x8x128xf32>
    tpu.vector_store %arg8[%c0_64, %c0_65, %c0_66], %126 {strides = array<i32>} : memref<1x8x128xf32, #tpu.memory_space<vmem>>, vector<1x8x128xf32>,
    return
  }
  func.func @transform_0(%arg0: i32) -> i32 {
    %c0_i32 = arith.constant 0 : i32
    %c0_i32_0 = arith.constant 0 : i32
    return %c0_i32 : i32
  }
  func.func @transform_1(%arg0: i32) -> (i32, i32, i32) {
    %c0_i32 = arith.constant 0 : i32
    %c0_i32_0 = arith.constant 0 : i32
    %c0_i32_1 = arith.constant 0 : i32
    return %arg0, %c0_i32, %c0_i32_0 : i32, i32, i32
  }
  func.func @transform_2(%arg0: i32) -> (i32, i32, i32) {
    %c0_i32 = arith.constant 0 : i32
    %c0_i32_0 = arith.constant 0 : i32
    %c0_i32_1 = arith.constant 0 : i32
    %c0_i32_2 = arith.constant 0 : i32
    return %c0_i32, %c0_i32_0, %c0_i32_1 : i32, i32, i32
  }
  func.func @transform_3(%arg0: i32) -> (i32, i32) {
    %c0_i32 = arith.constant 0 : i32
    %c0_i32_0 = arith.constant 0 : i32
    %c0_i32_1 = arith.constant 0 : i32
    return %c0_i32, %c0_i32_0 : i32, i32
  }
  func.func @transform_4(%arg0: i32) -> (i32, i32, i32) {
    %c0_i32 = arith.constant 0 : i32
    %c0_i32_0 = arith.constant 0 : i32
    %c0_i32_1 = arith.constant 0 : i32
    %c0_i32_2 = arith.constant 0 : i32
    return %c0_i32, %c0_i32_0, %c0_i32_1 : i32, i32, i32
  }
  func.func @transform_5(%arg0: i32) -> (i32, i32, i32) {
    %c0_i32 = arith.constant 0 : i32
    %c0_i32_0 = arith.constant 0 : i32
    %c0_i32_1 = arith.constant 0 : i32
    return %arg0, %c0_i32, %c0_i32_0 : i32, i32, i32
  }
  func.func @transform_6(%arg0: i32) -> (i32, i32, i32) {
    %c0_i32 = arith.constant 0 : i32
    %c0_i32_0 = arith.constant 0 : i32
    %c0_i32_1 = arith.constant 0 : i32
    return %arg0, %c0_i32, %c0_i32_0 : i32, i32, i32
  }
  func.func @transform_7(%arg0: i32) -> (i32, i32, i32) {
    %c0_i32 = arith.constant 0 : i32
    %c0_i32_0 = arith.constant 0 : i32
    %c0_i32_1 = arith.constant 0 : i32
    return %arg0, %c0_i32, %c0_i32_0 : i32, i32, i32
  }
}

</mosaic_0001>

<bundles_post_ra>
// kernel: quant_depthwise_node_forward.5
= control target key start
LH: loop header
LB: loop body
LE: loop exit
PB: predicated region body
PF: predicated region fallthrough
CT: control target
= control target key end

     0   :  { %9 = vsyncpa [#allocation3], 0  ;;  %s620_s15 = smov 0   ;;  %s622_s16 = smov 0   ;;  %s695_s0 = inlined_call_operand.vmem [shape: f32[3], index: 0, kind: input, shape index: {}]   ;;  %s696_s1 = inlined_call_operand.vmem [shape: f32[2,8,256], index: 1, kind: input, shape index: {}]   ;;  %s697_s2 = inlined_call_operand.vmem [shape: f32[16,8], index: 2, kind: input, shape index: {}]   ;;  %s698_s3 = inlined_call_operand.vmem [shape: f32[16,1], index: 3, kind: input, shape index: {}]   ;;  %s699_s4 = inlined_call_operand.vmem [shape: f32[2,16,256], index: 4, kind: output, shape index: {}]  }
   0x1   :  { %s624_s17 = smov 0  }
   0x2 LB: > { %s474_s18 = sadd.s32 4294967295, %s590_s17   ;;  %s27_s19 = sadd.s32 1, %s586_s16  ;;  %s590_s17 = sphi %s624_s17, %s15_s17   ;;  %s586_s16 = sphi %s622_s16, %s703_s16   ;;  %s582_s15 = sphi %s620_s15, %s702_s15  }
   0x3   : > { %p29_p0 = scmp.ge.s32.totalorder %s27_s19, 2  ;;  %p476_p1 = scmp.ge.s32.totalorder %s590_s17, 1 }
   0x4   : > { %p151_p2 = scmp.lt.s32.totalorder %s590_s17, 3  ;;  %p645_p4 = scmp.eq.s32.totalorder %s474_s18, 0 }
   0x5   : > { %s705_s19 = smov (%p29_p0, %s27_s19), 0  ;;  %s164_s24 = sshll.u32 %s695_s0, 4  ;;  %s165_s24 = int_to_ptr.vmem [resolvable:$true] %s164_s24 }
   0x6   : > { %p641_p3 = pnand %p476_p1, %p151_p2  ;;  %s549_s25 = scalar_lea.vmem %s165_s24, 16 }
   0x7   : > { %p550_p7 = scmp.ne.s32.totalorder %s165_s24, %s549_s25  ;;  %p557_p11 = scmp.lt.s32.totalorder %s165_s24, %s165_s24 }
   0x8   : > { %p515_p5 = pneg %p641_p3  ;;  %p558_p12 = scmp.lt.s32.totalorder %s549_s25, %s549_s25 }
   0xa   : > { %p516_p6 = pnand %p645_p4, %p515_p5  ;;  %p559_p13 = por %p558_p12, %p557_p11 }
   0xc   : > { %p551_p8 = pneg %p516_p6 }
   0xe   : > { %p552_p9 = pnand %p551_p8, %p550_p7 }
  0x10   : > { %p553_p10 = pneg %p552_p9 }
  0x12   : > { %p560_p0 = pnand %p559_p13, %p553_p10 }
  0x14   : > { %563 = shalt.err (!%p560_p0)
}
  0x15   : > { %s592_s26 = smov [#allocation2]   ;;  %196 = sbr.rel (%p641_p3) target bundleno = 257 (0x101), region = 36 }
  0x16   : > { %518 = dma.vmem_to_smem (!%p516_p6), %s165_s24, 16, %s592_s26, [#allocation3]  }
  0x1a   : > { %577 = dma.done.wait (%p645_p4), [#allocation3], 16  }
  0x1b   : > { %579 = vsyncadd (%p645_p4), [#allocation3], 4294967280 }
  0x1c   : > { %202 = sfence }
  0x1d   : > { %p232_p1 = scmp.lt.s32.totalorder %s582_s15, 1  ;;  %s485_s27 = sld [smem:[#allocation2 + $0x1]]  ;;  %v593_v0 = vmov 0.0   ;;  %v275_v1 = vld [vmem:[%s698_s3] sm:$0xff]  ;;  %v594_v2 = vmov 0   ;;  %v276_v3 = vld [vmem:[%s698_s3 + $0x8] sm:$0xff] }
  0x1e   : > { %358 = vmatprep.mubr.f32.mxu0 %v593_v0  ;;  %364 = vmatprep.mubr.f32.mxu1 %v593_v0  ;;  %s486_s10 = sld [smem:[#allocation2 + $0x2]]  ;;  %v273_v35 = vld [vmem:[%s697_s2] sm:$0xff]  ;;  %vm287_vm2 = vcmask 64512   ;;  %v274_v36 = vld [vmem:[%s697_s2 + $0x8] sm:$0xff] }
  0x1f   : > { %s707_s15 = smov (!%p232_p1, %s582_s15), 1  ;;  %548 = vset.pattern.permute.xlu0 %v594_v2  ;;  %s251_s11 = sld [smem:[#allocation2]] }
  0x20   : > { %279 = vperm.xlu0 %548, %v275_v1   ;;  %s491_s30 = sshll.u32 %s707_s15, 4  ;;  %s492_s20 = sshll.u32 %s707_s15, 5 }
  0x21   : > { %s239_s9 = scalar_lea.vmem %s696_s1, %s491_s30  ;;  %s249_s23 = scalar_lea.vmem %s699_s4, %s492_s20 }
  0x22   : > { %v255_v4 = vld [vmem:[%s239_s9 + $0x8] sm:$0xff]  ;;  %v254_v5 = vld [vmem:[%s239_s9] sm:$0xff] }
  0x23   : > { %v256_v6 = vstv %s485_s27 }
  0x24   : > { %284 = vperm.xlu0 %548, %v276_v3   ;;  %v258_v7 = vmul.f32 %v256_v6, %v255_v4  ;;  %v257_v8 = vmul.f32 %v256_v6, %v254_v5  ;;  %v261_v20 = vstv %s486_s10 }
  0x25   : > { %v270_v29 = vstv %s251_s11 }
  0x26   : > { %v505_v9 = vcvt.f32.s32 %v258_v7  ;;  %v503_v10 = vand.u32 2147483647, %v258_v7  ;;  %v497_v11 = vcvt.f32.s32 %v257_v8  ;;  %v508_v13 = vand.u32 2147483648, %v258_v7 }
  0x27   : > { %v495_v14 = vand.u32 2147483647, %v257_v8  ;;  %v500_v16 = vand.u32 2147483648, %v257_v8 }
  0x28   : > { %v506_v12 = vcvt.s32.f32 %v505_v9  ;;  %v498_v15 = vcvt.s32.f32 %v497_v11  ;;  %vm504_vm0 = vcmp.lt.f32.partialorder %v503_v10, 8388608.0 }
  0x29   : > { %vm496_vm1 = vcmp.lt.f32.partialorder %v495_v14, 8388608.0 }
  0x2a   : > { %v507_v17 = vand.u32 2147483647, %v506_v12  ;;  %v499_v18 = vand.u32 2147483647, %v498_v15 }
  0x2c   : > { %v509_v19 = vor.u32 %v508_v13, %v507_v17  ;;  %v501_v21 = vor.u32 %v500_v16, %v499_v18 }
  0x2e   : > { %v510_v22 = vsel %vm504_vm0, %v509_v19, %v258_v7  ;;  %v502_v24 = vsel %vm496_vm1, %v501_v21, %v257_v8 }
  0x2f   : > { %v263_v23 = vsub.f32 %v510_v22, %v261_v20  ;;  %v262_v25 = vsub.f32 %v502_v24, %v261_v20 }
  0x31   : > { %v265_v26 = vmax.f32 %v263_v23, 0.0  ;;  %v264_v27 = vmax.f32 %v262_v25, 0.0 }
  0x33   : > { %v267_v28 = vmin.f32 %v265_v26, 255.0  ;;  %v266_v30 = vmin.f32 %v264_v27, 255.0 }
  0x35   : > { %v269_v31 = vadd.f32 %v267_v28, %v261_v20  ;;  %v268_v32 = vadd.f32 %v266_v30, %v261_v20 }
  0x37   : > { %v272_v33 = vmul.f32 %v270_v29, %v269_v31  ;;  %v271_v34 = vmul.f32 %v270_v29, %v268_v32 }
  0x39   : > { %324 = vmatprep.subr.mxu0 %v272_v33  ;;  %493 = vmatprep.subr.mxu1 %v272_v33 }
  0x3a   : > { %325 = vmatpush1.msra.mxu0 %v271_v34  ;;  %494 = vmatpush1.msra.mxu1 %v271_v34 }
  0x3b   : > { %487 = vmatmul.mubr.msk.f32.vlgmr.msra.gmra.mxu0 %vm287_vm2, %v273_v35  ;;  %488 = vmatmul.mubr.msk.f32.vlgmr.msra.gmra.mxu1 %vm287_vm2, %v274_v36 }
  0x9b   : > { %v280_v37 = vpop.permute.xlu0 %279 }
  0x9f   : > { %v285_v38 = vpop.permute.xlu0 %284 }
  0xfb   : > { %v360_v39 = vpop.f32.mrf.mxu0  ;;  %v366_v40 = vpop.f32.mrf.mxu1 }
  0xfc   : > { %v361_v41 = vadd.f32 %v360_v39, %v280_v37  ;;  %v367_v42 = vadd.f32 %v366_v40, %v285_v38 }
  0xfd   : > { %v362_v43 = vpop.f32.mrf.mxu0  ;;  %v368_v44 = vpop.f32.mrf.mxu1 }
  0xfe   : > { %371 = vst [vmem:[%s249_s23] sm:$0xff] %v361_v41  ;;  %373 = vst [vmem:[%s249_s23 + $0x10] sm:$0xff] %v367_v42  ;;  %v363_v45 = vadd.f32 %v362_v43, %v280_v37  ;;  %v369_v46 = vadd.f32 %v368_v44, %v285_v38 }
 0x100   : > { %372 = vst [vmem:[%s249_s23 + $0x8] sm:$0xff] %v363_v45  ;;  %374 = vst [vmem:[%s249_s23 + $0x18] sm:$0xff] %v369_v46 }
 0x101 PF: > { %s15_s17 = sadd.s32 1, %s590_s17   ;;  %s702_s15 = smov %s586_s16 }
 0x102   : > { %p12_p2 = scmp.ge.s32.totalorder %s15_s17, 4   ;;  %s703_s16 = smov %s705_s19 }
 0x104   :  { %14 = sbr.rel (!%p12_p2) target bundleno = 2 (0x2), region = 71 }
 0x109   :  { %405 = vsyncpa [#allocation3], 1 }
 0x10a   :  { %407 = vsyncpa [#allocation3 + $0x1], 1 }

// kernel: quant_depthwise_node_forward.3
= control target key start
LH: loop header
LB: loop body
LE: loop exit
PB: predicated region body
PF: predicated region fallthrough
CT: control target
= control target key end

     0   :  { %s694_s18 = smov 0   ;;  %s696_s19 = smov 0   ;;  %s744_s0 = inlined_call_operand.vmem [shape: f32[2,4,256], index: 0, kind: input, shape index: {}]   ;;  %s745_s1 = inlined_call_operand.vmem [shape: f32[8,4], index: 1, kind: input, shape index: {}]   ;;  %s746_s2 = inlined_call_operand.vmem [shape: f32[8,1], index: 2, kind: input, shape index: {}]   ;;  %s747_s3 = inlined_call_operand.vmem [shape: f32[2,8,256], index: 3, kind: output, shape index: {0}]   ;;  %s748_s4 = inlined_call_operand.vmem [shape: f32[2,1,8,128], index: 4, kind: output, shape index: {1}]   ;;  %s749_s5 = inlined_call_operand.vmem [shape: f32[2,1,8,128], index: 5, kind: output, shape index: {2}]  }
   0x1   :  { %s698_s20 = smov 0  }
   0x2 LB: > { %s28_s21 = sadd.s32 1, %s656_s19  ;;  %p592_p0 = scmp.ge.s32.totalorder %s660_s20, 1  ;;  %s660_s20 = sphi %s698_s20, %s16_s20   ;;  %s656_s19 = sphi %s696_s19, %s751_s19   ;;  %s652_s18 = sphi %s694_s18, %s750_s18  }
   0x3   : > { %p30_p1 = scmp.ge.s32.totalorder %s28_s21, 2  ;;  %p217_p2 = scmp.lt.s32.totalorder %s660_s20, 3 }
   0x5   : > { %s753_s21 = smov (%p30_p1, %s28_s21), 0  ;;  %p218_p3 = pnand %p592_p0, %p217_p2 }
   0x6   : > { %p268_p4 = scmp.lt.s32.totalorder (!%p218_p3), %s652_s18, 1 }
   0x7   : > { %221 = sbr.rel (%p218_p3) target bundleno = 424 (0x1a8), region = 32 }
   0xc   : > { %v662_v0 = vmov 0.0   ;;  %v663_v1 = vmov 0   ;;  %v303_v2 = vld [vmem:[%s746_s2] sm:$0xff]  ;;  %s755_s18 = smov (!%p268_p4, %s652_s18), 1  ;;  %vm315_vm0 = vcmask 1043456   ;;  %vm311_vm1 = vcmask 31744  }
   0xd   : > { %384 = vmatprep.mubr.f32.mxu0 %v662_v0  ;;  %636 = vset.pattern.permute.xlu0 %v663_v1  ;;  %s715_s24 = sshll.u32 %s755_s18, 3  ;;  %v302_v5 = vld [vmem:[%s745_s1] sm:$0xff]  ;;  %s605_s30 = sshll.u32 %s755_s18, 4 }
   0xe   : > { %306 = vperm.xlu0 %636, %v303_v2   ;;  %s275_s27 = scalar_lea.vmem %s744_s0, %s715_s24  ;;  %s285_s8 = scalar_lea.vmem %s747_s3, %s605_s30 }
   0xf   : > { %v301_v3 = vld [vmem:[%s275_s27] sm:$0xff]  ;;  %s293_s11 = scalar_lea.vmem %s748_s4, %s715_s24  ;;  %s300_s15 = scalar_lea.vmem %s749_s5, %s715_s24 }
  0x10   : > { %v310_v4 = vcombine.high %v301_v3, %v301_v3 }
  0x12   : > { %599 = vmatprep.subr.msk.mxu0 %vm315_vm0, %v310_v4 }
  0x13   : > { %600 = vmatpush1.msk.msra.mxu0 %vm315_vm0, %v301_v3 }
  0x14   : > { %601 = vmatmul.mubr.msk.f32.vlgmr.msra.gmra.mxu0 %vm311_vm1, %v302_v5 }
  0x89   : > { %v307_v6 = vpop.permute.xlu0 %306 }
  0xd4   : > { %v386_v7 = vpop.f32.mrf.mxu0 }
  0xd5   : > { %v387_v8 = vadd.f32 %v386_v7, %v307_v6 }
  0xd6   : > { %v388_v9 = vpop.f32.mrf.mxu0 }
  0xd7   : > { %v391_v10 = vmax.f32 %v387_v8, 0.0  ;;  %v389_v11 = vadd.f32 %v388_v9, %v307_v6 }
  0xd9   : > { %393 = vst [vmem:[%s285_s8] sm:$0xff] %v391_v10  ;;  %v392_v12 = vmax.f32 %v389_v11, 0.0 }
  0xdb   : > { %394 = vst [vmem:[%s285_s8 + $0x8] sm:$0xff] %v392_v12  ;;  %v407_v13 = vmax.f32 %v391_v10, %v392_v12  ;;  %v395_v14 = vmin.f32 %v391_v10, %v392_v12 }
  0xdd   : > { %408 = vmax.xlane.f32.xlu1 %v407_v13  ;;  %396 = vmin.xlane.f32.xlu0 %v395_v14 }
 0x166   : > { %v409_v15 = vpop.xlane.xlu1 %408  ;;  %v397_v16 = vpop.xlane.xlu0 %396 }
 0x167   : > { %v410_v17 = vrot.slane %v409_v15, 4  ;;  %v398_v18 = vrot.slane %v397_v16, 4 }
 0x169   : > { %v411_v19 = vmax.f32 %v409_v15, %v410_v17  ;;  %v399_v20 = vmin.f32 %v397_v16, %v398_v18 }
 0x16b   : > { %v412_v21 = vrot.slane %v411_v19, 2  ;;  %v400_v22 = vrot.slane %v399_v20, 2 }
 0x16d   : > { %v413_v23 = vmax.f32 %v411_v19, %v412_v21  ;;  %v401_v24 = vmin.f32 %v399_v20, %v400_v22 }
 0x16f   : > { %v402_v25 = vrot.slane %v401_v24, 1  ;;  %v414_v26 = vrot.slane %v413_v23, 1 }
 0x171   : > { %v403_v27 = vmin.f32 %v401_v24, %v402_v25  ;;  %v415_v28 = vmax.f32 %v413_v23, %v414_v26 }
 0x173   : > { %606 = vpush %v403_v27 }
 0x174   : > { %608 = vpush %v415_v28 }
 0x1a4   : > { %s607_s12 = spop %606 }
 0x1a5   : > { %v405_v29 = vstv %s607_s12  ;;  %s609_s16 = spop %608 }
 0x1a6   : > { %406 = vst [vmem:[%s293_s11] sm:$0xff] %v405_v29  ;;  %v417_v30 = vstv %s609_s16 }
 0x1a7   : > { %418 = vst [vmem:[%s300_s15] sm:$0xff] %v417_v30 }
 0x1a8 PF: > { %s16_s20 = sadd.s32 1, %s660_s20   ;;  %s750_s18 = smov %s656_s19 }
 0x1a9   : > { %p13_p5 = scmp.ge.s32.totalorder %s16_s20, 4   ;;  %s751_s19 = smov %s753_s21 }
 0x1ab   :  { %15 = sbr.rel (!%p13_p5) target bundleno = 2 (0x2), region = 86 }

// kernel: quant_depthwise_node_forward.4
= control target key start
LH: loop header
LB: loop body
LE: loop exit
PB: predicated region body
PF: predicated region fallthrough
CT: control target
= control target key end

     0   :  { %13 = vsyncpa [#allocation3], 0  ;;  %s953_s24 = smov 0   ;;  %s1153_s0 = inlined_call_operand.vmem [shape: f32[3], index: 0, kind: input, shape index: {}]   ;;  %s1154_s1 = inlined_call_operand.vmem [shape: f32[2,8,256], index: 1, kind: input, shape index: {}]   ;;  %s1155_s2 = inlined_call_operand.vmem [shape: f32[9,8,1], index: 2, kind: input, shape index: {}]   ;;  %s1156_s3 = inlined_call_operand.vmem [shape: f32[8,1], index: 3, kind: input, shape index: {}]   ;;  %s1157_s4 = inlined_call_operand.vmem [shape: f32[9,1,256], index: 4, kind: input, shape index: {}]   ;;  %s1158_s5 = inlined_call_operand.vmem [shape: f32[2,8,256], index: 5, kind: output, shape index: {0}]   ;;  %s1159_s6 = inlined_call_operand.vmem [shape: f32[2,8,128], index: 6, kind: output, shape index: {1}]   ;;  %s1160_s7 = inlined_call_operand.vmem [shape: f32[2,8,128], index: 7, kind: output, shape index: {2}]  }
   0x1 LB: > { %s959_s25 = sadd.s32 4294967295, %s901_s24   ;;  %p793_p0 = scmp.ge.s32.totalorder %s901_s24, 1  ;;  %s901_s24 = sphi %s953_s24, %s19_s24  }
   0x2   : > { %p212_p1 = scmp.lt.s32.totalorder %s901_s24, 3  ;;  %s225_s28 = sshll.u32 %s1153_s0, 4  ;;  %s226_s28 = int_to_ptr.vmem [resolvable:$true] %s225_s28 }
   0x3   : > { %p854_p3 = scmp.eq.s32.totalorder %s959_s25, 0  ;;  %s876_s30 = scalar_lea.vmem %s226_s28, 16 }
   0x4   : > { %p966_p2 = pnand %p793_p0, %p212_p1  ;;  %p877_p6 = scmp.ne.s32.totalorder %s226_s28, %s876_s30 }
   0x5   : > { %p884_p10 = scmp.lt.s32.totalorder %s226_s28, %s226_s28  ;;  %p885_p11 = scmp.lt.s32.totalorder %s876_s30, %s876_s30 }
   0x6   : > { %p850_p4 = pneg %p966_p2 }
   0x7   : > { %p886_p12 = por %p885_p11, %p884_p10 }
   0x8   : > { %p851_p5 = pnand %p854_p3, %p850_p4 }
   0xa   : > { %p878_p7 = pneg %p851_p5 }
   0xc   : > { %p879_p8 = pnand %p878_p7, %p877_p6 }
   0xe   : > { %p880_p9 = pneg %p879_p8 }
  0x10   : > { %p887_p13 = pnand %p886_p12, %p880_p9 }
  0x12   : > { %890 = shalt.err (!%p887_p13)
}
  0x13   : > { %s903_s8 = smov [#allocation2]   ;;  %255 = sbr.rel (%p966_p2) target bundleno = 431 (0x1af), region = 40 }
  0x14   : > { %853 = dma.vmem_to_smem (!%p851_p5), %s226_s28, 16, %s903_s8, [#allocation3]  }
  0x18   : > { %896 = dma.done.wait (%p854_p3), [#allocation3], 16  }
  0x19   : > { %898 = vsyncadd (%p854_p3), [#allocation3], 4294967280 }
  0x1a   : > { %261 = sfence }
  0x1b   : > { %v359_v0 = vld [vmem:[%s1155_s2] sm:$0xff]  ;;  %v811_v1 = vld [vmem:[%s1155_s2 + $0x18] sm:$0xff]  ;;  %p296_p0 = scmp.lt.s32.totalorder %s959_s25, 1  ;;  %v904_v2 = vmov 0   ;;  %v807_v3 = vld [vmem:[%s1155_s2 + $0x8] sm:$0xff]  ;;  %s804_s17 = sld [smem:[#allocation2 + $0x1]]  ;;  %v340_v53 = vlaneseq }
  0x1c   : > { %874 = vset.pattern.permute.xlu0 %v904_v2  ;;  %875 = vset.pattern.permute.xlu1 %v904_v2  ;;  %v815_v4 = vld [vmem:[%s1155_s2 + $0x28] sm:$0xff]  ;;  %v809_v5 = vld [vmem:[%s1155_s2 + $0x10] sm:$0xff]  ;;  %s805_s26 = sld [smem:[#allocation2 + $0x2]]  ;;  %v813_v11 = vld [vmem:[%s1155_s2 + $0x20] sm:$0xff]  ;;  %s905_s30 = smov 16  }
  0x1d   : > { %362 = vperm.xlu0 %874, %v359_v0   ;;  %461 = vperm.xlu1 %875, %v811_v1   ;;  %s1163_s25 = smov (!%p296_p0, %s959_s25), 1  ;;  %s314_s29 = sld [smem:[#allocation2]]  ;;  %v817_v38 = vld [vmem:[%s1155_s2 + $0x30] sm:$0xff]  ;;  %v821_v39 = vld [vmem:[%s1155_s2 + $0x40] sm:$0xff]  ;;  %v819_v40 = vld [vmem:[%s1155_s2 + $0x38] sm:$0xff]  ;;  %v348_v54 = vshrl.u32 %v340_v53, 7 }
  0x1e   : > { %s824_s18 = sshll.u32 %s1163_s25, 4  ;;  %s906_s8 = smov 17   ;;  %v626_v41 = vld [vmem:[%s1156_s3] sm:$0xff]  ;;  %v1049_v57 = vand.u32 127, %v340_v53 }
  0x1f   : > { %s300_s21 = scalar_lea.vmem %s1154_s1, %s824_s18  ;;  %s907_s9 = smov 15   ;;  %v806_v58 = vld [vmem:[%s1157_s4 + $0x2] sm:$0x3]  ;;  %v1054_v59 = vsub.s32 0, %v348_v54  ;;  %v1056_v60 = vsub.s32 1, %v348_v54 }
  0x20   : > { %v317_v6 = vld [vmem:[%s300_s21] sm:$0xff]  ;;  %v318_v7 = vld [vmem:[%s300_s21 + $0x8] sm:$0xff]  ;;  %s908_s10 = smov 1   ;;  %s909_s11 = smov 127   ;;  %vm373_vm2 = vcmp.lt.s32.totalorder %v1049_v57, 16  ;;  %vm342_vm3 = vcmp.lt.s32.totalorder %v1049_v57, 17 }
  0x21   : > { %395 = vperm.xlu0 %874, %v807_v3   ;;  %520 = vperm.xlu1 %875, %v815_v4   ;;  %v319_v8 = vstv %s804_s17  ;;  %s910_s14 = smov 113   ;;  %s911_s15 = smov 112   ;;  %v345_v61 = vld [vmem:[%s1157_s4] sm:$0x3]  ;;  %v808_v62 = vld [vmem:[%s1157_s4 + $0x4] sm:$0x3]  ;;  %v382_v63 = vrot.slane %v806_v58, %v1054_v59  ;;  %v386_v0 = vrot.slane %v806_v58, %v1056_v60 }
  0x22   : > { %v320_v9 = vmul.f32 %v319_v8, %v317_v6  ;;  %v321_v10 = vmul.f32 %v319_v8, %v318_v7  ;;  %v324_v23 = vstv %s805_s26  ;;  %s912_s21 = smov 111   ;;  %vm406_vm4 = vcmp.lt.s32.totalorder %v1049_v57, 15  ;;  %v810_v6 = vld [vmem:[%s1157_s4 + $0x6] sm:$0x3]  ;;  %s305_s26 = scalar_lea.vmem %s1158_s5, %s824_s18 }
  0x23   : > { %v333_v32 = vstv %s314_s29  ;;  %v350_v3 = vrot.slane %v345_v61, %v1054_v59  ;;  %v354_v7 = vrot.slane %v345_v61, %v1056_v60  ;;  %v415_v8 = vrot.slane %v808_v62, %v1054_v59  ;;  %s802_s18 = sshll.u32 %s1163_s25, 3 }
  0x24   : > { %v828_v12 = vcvt.f32.s32 %v320_v9  ;;  %v826_v13 = vand.u32 2147483647, %v320_v9  ;;  %v836_v14 = vcvt.f32.s32 %v321_v10  ;;  %v831_v16 = vand.u32 2147483648, %v320_v9  ;;  %s309_s29 = scalar_lea.vmem %s1159_s6, %s802_s18 }
  0x25   : > { %428 = vperm.xlu0 %874, %v809_v5   ;;  %v834_v17 = vand.u32 2147483647, %v321_v10  ;;  %v839_v19 = vand.u32 2147483648, %v321_v10  ;;  %vm439_vm5 = vcmp.lt.s32.totalorder %v1049_v57, 1  ;;  %vm498_vm6 = vcmp.lt.s32.totalorder %v1049_v57, 127 }
  0x26   : > { %v829_v15 = vcvt.s32.f32 %v828_v12  ;;  %v837_v18 = vcvt.s32.f32 %v836_v14  ;;  %vm827_vm0 = vcmp.lt.f32.partialorder %v826_v13, 8388608.0  ;;  %vm531_vm7 = vcmp.lt.s32.totalorder %v1049_v57, 113 }
  0x27   : > { %vm835_vm1 = vcmp.lt.f32.partialorder %v834_v17, 8388608.0  ;;  %v452_v17 = vrot.slane %v810_v6, %v1056_v60  ;;  %vm564_vm8 = vcmp.lt.s32.totalorder %v1049_v57, 112  ;;  %vm597_vm9 = vcmp.lt.s32.totalorder %v1049_v57, 111 }
  0x28   : > { %v830_v20 = vand.u32 2147483647, %v829_v15  ;;  %v838_v21 = vand.u32 2147483647, %v837_v18 }
  0x29   : > { %487 = vperm.xlu0 %874, %v813_v11  }
  0x2a   : > { %v832_v22 = vor.u32 %v831_v16, %v830_v20  ;;  %v840_v24 = vor.u32 %v839_v19, %v838_v21  ;;  %v448_v16 = vrot.slane %v810_v6, %v1054_v59  ;;  %v812_v21 = vld [vmem:[%s1157_s4 + $0x8] sm:$0x3] }
  0x2c   : > { %v833_v25 = vsel %vm827_vm0, %v832_v22, %v320_v9  ;;  %v841_v27 = vsel %vm835_vm1, %v840_v24, %v321_v10  ;;  %v419_v9 = vrot.slane %v808_v62, %v1056_v60 }
  0x2d   : > { %v325_v26 = vsub.f32 %v833_v25, %v324_v23  ;;  %v326_v28 = vsub.f32 %v841_v27, %v324_v23 }
  0x2f   : > { %v327_v29 = vmax.f32 %v325_v26, 0.0  ;;  %v328_v30 = vmax.f32 %v326_v28, 0.0 }
  0x31   : > { %v329_v31 = vmin.f32 %v327_v29, 255.0  ;;  %v330_v33 = vmin.f32 %v328_v30, 255.0 }
  0x33   : > { %v331_v34 = vadd.f32 %v329_v31, %v324_v23  ;;  %v332_v35 = vadd.f32 %v330_v33, %v324_v23  ;;  %v814_v31 = vld [vmem:[%s1157_s4 + $0xa] sm:$0x3]  ;;  %v474_v33 = vrot.slane %v812_v21, %v1054_v59 }
  0x35   : > { %v1009_v36 = vmul.f32 %v333_v32, %v331_v34  ;;  %v1013_v37 = vmul.f32 %v333_v32, %v332_v35  ;;  %v478_v34 = vrot.slane %v812_v21, %v1056_v60 }
  0x37   : > { %369 = vrot.lane.b32.xlu0 %v1009_v36, %s905_s30  ;;  %336 = vrot.lane.b32.xlu1 %v1009_v36, %s906_s8  ;;  %v482_v54 = vmul.f32 %v478_v34, %v1013_v37 }
  0x3b   : > { %404 = vrot.lane.b32.xlu0 %v1013_v37, %s907_s9  ;;  %338 = vrot.lane.b32.xlu1 %v1013_v37, %s906_s8 }
  0x3f   : > { %435 = vrot.lane.b32.xlu0 %v1009_v36, %s908_s10  ;;  %371 = vrot.lane.b32.xlu1 %v1013_v37, %s905_s30 }
  0x43   : > { %494 = vrot.lane.b32.xlu0 %v1009_v36, %s909_s11  ;;  %402 = vrot.lane.b32.xlu1 %v1009_v36, %s907_s9 }
  0x47   : > { %553 = vperm.xlu0 %874, %v817_v38   ;;  %437 = vrot.lane.b32.xlu1 %v1013_v37, %s908_s10  ;;  %s313_s10 = scalar_lea.vmem %s1160_s7, %s802_s18 }
  0x4b   : > { %529 = vrot.lane.b32.xlu0 %v1013_v37, %s910_s14  ;;  %496 = vrot.lane.b32.xlu1 %v1013_v37, %s909_s11 }
  0x4f   : > { %560 = vrot.lane.b32.xlu0 %v1009_v36, %s911_s15  ;;  %527 = vrot.lane.b32.xlu1 %v1009_v36, %s910_s14 }
  0x53   : > { %619 = vperm.xlu0 %874, %v821_v39   ;;  %586 = vperm.xlu1 %875, %v819_v40  }
  0x57   : > { %562 = vrot.lane.b32.xlu1 %v1013_v37, %s911_s15  ;;  %595 = vrot.lane.b32.xlu0 %v1013_v37, %s912_s21 }
  0x5b   : > { %593 = vrot.lane.b32.xlu1 %v1009_v36, %s912_s21 }
  0x5f   : > { %629 = vperm.xlu1 %875, %v626_v41   ;;  %v507_v41 = vrot.slane %v814_v31, %v1054_v59 }
  0x98   : > { %v1041_v42 = vpop.permute.xlu0 %362  ;;  %v1043_v44 = vpop.permute.xlu1 %461 }
  0x9c   : > { %v396_v43 = vpop.permute.xlu0 %395  ;;  %v1045_v46 = vpop.permute.xlu1 %520 }
  0xa0   : > { %v429_v45 = vpop.permute.xlu0 %428 }
  0xa4   : > { %v1047_v47 = vpop.permute.xlu0 %487 }
  0xa9   : > { %v337_v48 = vpop.permute.xlu1 %336  ;;  %v370_v49 = vpop.permute.xlu0 %369 }
  0xad   : > { %v339_v50 = vpop.permute.xlu1 %338  ;;  %v405_v51 = vpop.permute.xlu0 %404 }
  0xae   : > { %v343_v10 = vsel %vm342_vm3, %v337_v48, %v339_v50  ;;  %v344_v11 = vsel %vm342_vm3, %v339_v50, %v337_v48  ;;  %v816_v48 = vld [vmem:[%s1157_s4 + $0xc] sm:$0x3] }
  0xaf   : > { %v357_v22 = vmul.f32 %v350_v3, %v344_v11  ;;  %v358_v23 = vmul.f32 %v354_v7, %v343_v10  ;;  %v540_v62 = vrot.slane %v816_v48, %v1054_v59 }
  0xb1   : > { %v372_v52 = vpop.permute.xlu1 %371  ;;  %v436_v55 = vpop.permute.xlu0 %435  ;;  %v365_v35 = vmul.f32 %v1041_v42, %v357_v22  ;;  %v366_v38 = vmul.f32 %v1041_v42, %v358_v23 }
  0xb2   : > { %v374_v4 = vsel %vm373_vm2, %v370_v49, %v372_v52  ;;  %v375_v5 = vsel %vm373_vm2, %v372_v52, %v370_v49 }
  0xb3   : > { %v389_v14 = vmul.f32 %v382_v63, %v375_v5  ;;  %v390_v15 = vmul.f32 %v386_v0, %v374_v4  ;;  %v544_v63 = vrot.slane %v816_v48, %v1056_v60 }
  0xb5   : > { %v403_v56 = vpop.permute.xlu1 %402  ;;  %v495_v1 = vpop.permute.xlu0 %494  ;;  %v398_v27 = vmul.f32 %v396_v43, %v389_v14  ;;  %v399_v28 = vmul.f32 %v396_v43, %v390_v15  ;;  %v511_v43 = vrot.slane %v814_v31, %v1056_v60 }
  0xb6   : > { %v407_v12 = vsel %vm406_vm4, %v403_v56, %v405_v51  ;;  %v408_v13 = vsel %vm406_vm4, %v405_v51, %v403_v56 }
  0xb7   : > { %v422_v24 = vmul.f32 %v415_v8, %v408_v13  ;;  %v423_v25 = vmul.f32 %v419_v9, %v407_v12  ;;  %v400_v49 = vadd.f32 %v398_v27, %v365_v35  ;;  %v401_v50 = vadd.f32 %v399_v28, %v366_v38  ;;  %v820_v12 = vld [vmem:[%s1157_s4 + $0x10] sm:$0x3] }
  0xb8   : > { %v491_v8 = vmul.f32 %v1047_v47, %v482_v54  ;;  %v610_v21 = vrot.slane %v820_v12, %v1056_v60 }
  0xb9   : > { %v438_v2 = vpop.permute.xlu1 %437  ;;  %v431_v39 = vmul.f32 %v429_v45, %v422_v24  ;;  %v432_v40 = vmul.f32 %v429_v45, %v423_v25  ;;  %v481_v45 = vmul.f32 %v474_v33, %v1009_v36 }
  0xba   : > { %v440_v19 = vsel %vm439_vm5, %v436_v55, %v438_v2  ;;  %v441_v20 = vsel %vm439_vm5, %v438_v2, %v436_v55 }
  0xbb   : > { %v455_v29 = vmul.f32 %v448_v16, %v441_v20  ;;  %v456_v30 = vmul.f32 %v452_v17, %v440_v19  ;;  %v433_v58 = vadd.f32 %v431_v39, %v400_v49  ;;  %v434_v61 = vadd.f32 %v432_v40, %v401_v50 }
  0xbc   : > { %v490_v7 = vmul.f32 %v1047_v47, %v481_v45  ;;  %v606_v20 = vrot.slane %v820_v12, %v1054_v59 }
  0xbd   : > { %v497_v26 = vpop.permute.xlu1 %496  ;;  %v464_v51 = vmul.f32 %v1043_v44, %v455_v29  ;;  %v465_v52 = vmul.f32 %v1043_v44, %v456_v30  ;;  %v818_v44 = vld [vmem:[%s1157_s4 + $0xe] sm:$0x3] }
  0xbe   : > { %v499_v55 = vsel %vm498_vm6, %v495_v1, %v497_v26  ;;  %v500_v56 = vsel %vm498_vm6, %v497_v26, %v495_v1  ;;  %v573_v5 = vrot.slane %v818_v44, %v1054_v59  ;;  %v577_v6 = vrot.slane %v818_v44, %v1056_v60 }
  0xbf   : > { %v466_v0 = vadd.f32 %v464_v51, %v433_v58  ;;  %v467_v2 = vadd.f32 %v465_v52, %v434_v61  ;;  %v514_v3 = vmul.f32 %v507_v41, %v499_v55  ;;  %v515_v1 = vmul.f32 %v511_v43, %v500_v56 }
  0xc1   : > { %v528_v53 = vpop.permute.xlu1 %527  ;;  %v493_v13 = vadd.f32 %v491_v8, %v467_v2  ;;  %v492_v14 = vadd.f32 %v490_v7, %v466_v0  ;;  %v523_v15 = vmul.f32 %v1045_v46, %v514_v3  ;;  %v524_v16 = vmul.f32 %v1045_v46, %v515_v1 }
  0xc2   : > { %v1079_v18 = vpop.permute.xlu0 %553 }
  0xc3   : > { %v525_v27 = vadd.f32 %v523_v15, %v492_v14  ;;  %v526_v46 = vadd.f32 %v524_v16, %v493_v13 }
  0xc6   : > { %v530_v32 = vpop.permute.xlu0 %529 }
  0xc7   : > { %v532_v36 = vsel %vm531_vm7, %v528_v53, %v530_v32  ;;  %v533_v37 = vsel %vm531_vm7, %v530_v32, %v528_v53 }
  0xc8   : > { %v547_v9 = vmul.f32 %v540_v62, %v532_v36  ;;  %v548_v10 = vmul.f32 %v544_v63, %v533_v37 }
  0xca   : > { %v561_v42 = vpop.permute.xlu0 %560  ;;  %v556_v22 = vmul.f32 %v1079_v18, %v547_v9  ;;  %v557_v23 = vmul.f32 %v1079_v18, %v548_v10 }
  0xcc   : > { %v558_v60 = vadd.f32 %v556_v22, %v525_v27  ;;  %v559_v32 = vadd.f32 %v557_v23, %v526_v46 }
  0xce   : > { %v587_v4 = vpop.permute.xlu1 %586  ;;  %v620_v11 = vpop.permute.xlu0 %619 }
  0xd2   : > { %v563_v17 = vpop.permute.xlu1 %562  ;;  %v596_v26 = vpop.permute.xlu0 %595 }
  0xd3   : > { %v565_v19 = vsel %vm564_vm8, %v561_v42, %v563_v17  ;;  %v566_v47 = vsel %vm564_vm8, %v563_v17, %v561_v42 }
  0xd4   : > { %v580_v24 = vmul.f32 %v573_v5, %v565_v19  ;;  %v581_v25 = vmul.f32 %v577_v6, %v566_v47 }
  0xd6   : > { %v589_v28 = vmul.f32 %v587_v4, %v580_v24  ;;  %v590_v29 = vmul.f32 %v587_v4, %v581_v25  ;;  %v594_v30 = vpop.permute.xlu1 %593 }
  0xd7   : > { %v598_v31 = vsel %vm597_vm9, %v594_v30, %v596_v26  ;;  %v599_v59 = vsel %vm597_vm9, %v596_v26, %v594_v30 }
  0xd8   : > { %v613_v33 = vmul.f32 %v606_v20, %v598_v31  ;;  %v614_v34 = vmul.f32 %v610_v21, %v599_v59  ;;  %v592_v38 = vadd.f32 %v590_v29, %v559_v32  ;;  %v591_v39 = vadd.f32 %v589_v28, %v558_v60 }
  0xda   : > { %v622_v18 = vmul.f32 %v620_v11, %v613_v33  ;;  %v623_v35 = vmul.f32 %v620_v11, %v614_v34  ;;  %v630_v43 = vpop.permute.xlu1 %629 }
  0xdc   : > { %v625_v40 = vadd.f32 %v623_v35, %v592_v38  ;;  %v624_v41 = vadd.f32 %v622_v18, %v591_v39 }
  0xde   : > { %v632_v48 = vadd.f32 %v630_v43, %v624_v41  ;;  %v633_v49 = vadd.f32 %v630_v43, %v625_v40 }
  0xe0   : > { %v634_v57 = vmax.f32 %v632_v48, 0.0  ;;  %v635_v50 = vmax.f32 %v633_v49, 0.0 }
  0xe2   : > { %636 = vst [vmem:[%s305_s26] sm:$0xff] %v634_v57  ;;  %637 = vst [vmem:[%s305_s26 + $0x8] sm:$0xff] %v635_v50  ;;  %v650_v51 = vmax.f32 %v634_v57, %v635_v50  ;;  %v638_v52 = vmin.f32 %v634_v57, %v635_v50 }
  0xe4   : > { %651 = vmax.xlane.f32.xlu1 %v650_v51  ;;  %639 = vmin.xlane.f32.xlu0 %v638_v52 }
 0x16d   : > { %v652_v53 = vpop.xlane.xlu1 %651  ;;  %v640_v42 = vpop.xlane.xlu0 %639 }
 0x16e   : > { %v653_v45 = vrot.slane %v652_v53, 4  ;;  %v641_v54 = vrot.slane %v640_v42, 4 }
 0x170   : > { %v654_v55 = vmax.f32 %v652_v53, %v653_v45  ;;  %v642_v56 = vmin.f32 %v640_v42, %v641_v54 }
 0x172   : > { %v655_v58 = vrot.slane %v654_v55, 2  ;;  %v643_v61 = vrot.slane %v642_v56, 2 }
 0x174   : > { %v656_v62 = vmax.f32 %v654_v55, %v655_v58  ;;  %v644_v63 = vmin.f32 %v642_v56, %v643_v61 }
 0x176   : > { %v645_v44 = vrot.slane %v644_v63, 1  ;;  %v657_v36 = vrot.slane %v656_v62, 1 }
 0x178   : > { %v646_v37 = vmin.f32 %v644_v63, %v645_v44  ;;  %v658_v0 = vmax.f32 %v656_v62, %v657_v36 }
 0x17a   : > { %842 = vpush %v646_v37 }
 0x17b   : > { %844 = vpush %v658_v0 }
 0x1ab   : > { %s843_s30 = spop %842 }
 0x1ac   : > { %v648_v2 = vstv %s843_s30  ;;  %s845_s11 = spop %844 }
 0x1ad   : > { %649 = vst [vmem:[%s309_s29] sm:$0xff] %v648_v2  ;;  %v660_v3 = vstv %s845_s11 }
 0x1ae   : > { %661 = vst [vmem:[%s313_s10] sm:$0xff] %v660_v3 }
 0x1af PF: > { %s19_s24 = sadd.s32 1, %s901_s24  }
 0x1b0   : > { %p16_p1 = scmp.ge.s32.totalorder %s19_s24, 4  }
 0x1b2   :  { %18 = sbr.rel (!%p16_p1) target bundleno = 1 (0x1), region = 115 }
 0x1b7   :  { %711 = vsyncpa [#allocation3], 1 }
 0x1b8   :  { %713 = vsyncpa [#allocation3 + $0x1], 1 }

</bundles_post_ra>
